<compile_context>
chip_gen: v7x
topology: tpu7x:2x2x1
jax: 0.10.0
libtpu: 0.0.40
codegen_flags: <defaults>
</compile_context>

<pallas_src>
import jax
import jax.numpy as jnp
from jax.experimental import pallas as pl
from jax.experimental.pallas import tpu as pltpu


def _round_up(x, m):
    return ((x + m - 1) // m) * m


def _critic_kernel(state_ref, action_ref,
                   ws1_ref, wa1_ref, b1_ref,
                   w2_ref, b2_ref, w3_ref, b3_ref,
                   q_ref):
    # ---- Layer 1: both heads fused along the output dim (2H wide). The
    # state/action concat is folded into row-split weights, so no separate
    # XLA concatenate op / HBM round-trip for `sa`.
    h1 = (jnp.dot(state_ref[...], ws1_ref[...], preferred_element_type=jnp.float32)
          + jnp.dot(action_ref[...], wa1_ref[...], preferred_element_type=jnp.float32)
          + b1_ref[...])
    h1 = jnp.maximum(h1, 0.0)                                     # [tb, 2H]

    # ---- Layer 2: single block-diagonal [2H, 2H] matmul on the full slab.
    # Exactly equivalent to the two per-head H x H matmuls (off-block weights
    # are true zeros); fills the 256-wide MXU on v6e/v7x, no relayout.
    h2 = jnp.dot(h1, w2_ref[...], preferred_element_type=jnp.float32) + b2_ref[...]
    h2 = jnp.maximum(h2, 0.0)                                     # [tb, 2H]

    # ---- Layer 3: block-column [2H, 2] weight -> q1 in lane 0, q2 in lane 1.
    q = jnp.dot(h2, w3_ref[...], preferred_element_type=jnp.float32) + b3_ref[...]

    # Single lane-contiguous [tb, 2] writeback.
    q_ref[...] = q.astype(q_ref.dtype)


def critic_forward(state, action, packed):
    """Pallas implementation of Critic.forward(state, action) -> (q1, q2)."""
    B, S = state.shape
    A = action.shape[1]

    # Round the batch only up to sublane granularity (max 7 padded rows) — no
    # full-tile padding copies of state/action.
    Bp = _round_up(max(B, 8), 8)
    if Bp != B:
        state = jnp.pad(state, ((0, Bp - B), (0, 0)))
        action = jnp.pad(action, ((0, Bp - B), (0, 0)))

    # Batch tiling: one big step for small/medium batches, 512-row tiles
    # (MXU-row aligned on all generations) for large ones.  Partial trailing
    # tiles are fine: rows are independent, out-of-bounds output rows are
    # discarded by Pallas and never read back.
    tb = Bp if Bp <= 512 else 512
    grid = (pl.cdiv(Bp, tb),)

    weights = (packed["ws1"], packed["wa1"], packed["b1"],
               packed["w2"], packed["b2"], packed["w3"], packed["b3"])

    def _resident(a):
        nd = a.ndim
        return pl.BlockSpec(a.shape, lambda i: (0,) * nd)

    in_specs = ([pl.BlockSpec((tb, S), lambda i: (i, 0)),     # state tile
                 pl.BlockSpec((tb, A), lambda i: (i, 0))]     # action tile
                + [_resident(a) for a in weights])

    q = pl.pallas_call(
        _critic_kernel,
        out_shape=jax.ShapeDtypeStruct((Bp, 2), jnp.float32),
        grid=grid,
        in_specs=in_specs,
        out_specs=pl.BlockSpec((tb, 2), lambda i: (i, 0)),
        compiler_params=pltpu.CompilerParams(
            dimension_semantics=("parallel",)),
    )(state, action, *weights)

    q = q[:B]
    return q[:, 0:1], q[:, 1:2]


# ---------------------------------------------------------------------------
# Parameter init (matches the torch module) + packing into the fused layout.
# ---------------------------------------------------------------------------
def _xavier_uniform(key, fan_in, fan_out, gain=1.0):
    # matches torch.nn.init.xavier_uniform_ (gain=1); stored [in, out]
    limit = gain * (6.0 / (fan_in + fan_out)) ** 0.5
    return jax.random.uniform(key, (fan_in, fan_out), jnp.float32, -limit, limit)


def init_critic_params(key, state_dim, action_dim, hidden_dim=128):
    in_dim = state_dim + action_dim
    dims = {"11": (in_dim, hidden_dim), "12": (hidden_dim, hidden_dim), "13": (hidden_dim, 1),
            "21": (in_dim, hidden_dim), "22": (hidden_dim, hidden_dim), "23": (hidden_dim, 1)}
    keys = jax.random.split(key, 2 * len(dims))
    params = {}
    for i, (name, (fi, fo)) in enumerate(dims.items()):
        params["w" + name] = _xavier_uniform(keys[2 * i], fi, fo)
        # torch.nn.init.uniform_(bias, -0.003, 0.003); kept 2-D [1, out] for TPU layout
        params["b" + name] = jax.random.uniform(keys[2 * i + 1], (1, fo), jnp.float32,
                                                -0.003, 0.003)
    return params


def pack_critic_params(params, state_dim):
    """Pack per-layer twin-head params into the fused layout the kernel uses."""
    H = params["w12"].shape[0]

    # Layer 1: heads concatenated along the output dim, rows split into
    # state / action groups so the cat([state, action]) is folded away.
    w1 = jnp.concatenate([params["w11"], params["w21"]], axis=1)        # [S+A, 2H]

    # Layer 2: block-diagonal [2H, 2H] (off-block entries exactly zero).
    w2 = jnp.zeros((2 * H, 2 * H), jnp.float32)
    w2 = w2.at[:H, :H].set(params["w12"])
    w2 = w2.at[H:, H:].set(params["w22"])

    # Layer 3: block-column [2H, 2] (head 1 -> column 0, head 2 -> column 1).
    w3 = jnp.zeros((2 * H, 2), jnp.float32)
    w3 = w3.at[:H, 0:1].set(params["w13"])
    w3 = w3.at[H:, 1:2].set(params["w23"])

    # TODO(synk): optionally cast matmul operand weights to bf16 (keep f32
    # accumulate) for large-batch training; left in f32 to keep 1e-4 tolerance.
    return {
        "ws1": w1[:state_dim],                                           # [S, 2H]
        "wa1": w1[state_dim:],                                           # [A, 2H]
        "b1": jnp.concatenate([params["b11"], params["b21"]], axis=1),   # [1, 2H]
        "w2": w2,                                                        # [2H, 2H]
        "b2": jnp.concatenate([params["b12"], params["b22"]], axis=1),   # [1, 2H]
        "w3": w3,                                                        # [2H, 2]
        "b3": jnp.concatenate([params["b13"], params["b23"]], axis=1),   # [1, 2]
    }


def _reference_forward(state, action, params):
    sa = jnp.concatenate([state, action], axis=1)
    x1 = jnp.maximum(sa @ params["w11"] + params["b11"], 0.0)
    x1 = jnp.maximum(x1 @ params["w12"] + params["b12"], 0.0)
    q1 = x1 @ params["w13"] + params["b13"]
    x2 = jnp.maximum(sa @ params["w21"] + params["b21"], 0.0)
    x2 = jnp.maximum(x2 @ params["w22"] + params["b22"], 0.0)
    q2 = x2 @ params["w23"] + params["b23"]
    return q1, q2


if __name__ == "__main__":
    key = jax.random.PRNGKey(0)
    k_param, k_state, k_action = jax.random.split(key, 3)

    batch = 8
    state_dim = 16
    action_dim = 4
    hidden_dim = 128

    params = init_critic_params(k_param, state_dim, action_dim, hidden_dim)
    packed = pack_critic_params(params, state_dim)
    state = jax.random.normal(k_state, (batch, state_dim), jnp.float32)
    action = jax.random.normal(k_action, (batch, action_dim), jnp.float32)

    fwd = jax.jit(critic_forward)
    q1, q2 = fwd(state, action, packed)
    jax.block_until_ready((q1, q2))

    # sanity check against a pure-JAX reference built from the unfused params
    r1, r2 = _reference_forward(state, action, params)
    assert q1.shape == (batch, 1) and q2.shape == (batch, 1)
    assert jnp.allclose(q1, r1, atol=1e-4, rtol=1e-4), float(jnp.max(jnp.abs(q1 - r1)))
    assert jnp.allclose(q2, r2, atol=1e-4, rtol=1e-4), float(jnp.max(jnp.abs(q2 - r2)))

    print("KERNEL_OK")
</pallas_src>

<mosaic_0001>
module attributes {stable_mosaic.version = 11 : i64} {
  func.func @_critic_kernel(%arg0: i32, %arg1: memref<8x16xf32, #tpu.memory_space<vmem>>, %arg2: memref<8x4xf32, #tpu.memory_space<vmem>>, %arg3: memref<16x256xf32, #tpu.memory_space<vmem>>, %arg4: memref<4x256xf32, #tpu.memory_space<vmem>>, %arg5: memref<1x256xf32, #tpu.memory_space<vmem>>, %arg6: memref<256x256xf32, #tpu.memory_space<vmem>>, %arg7: memref<1x256xf32, #tpu.memory_space<vmem>>, %arg8: memref<256x2xf32, #tpu.memory_space<vmem>>, %arg9: memref<1x2xf32, #tpu.memory_space<vmem>>, %arg10: memref<8x2xf32, #tpu.memory_space<vmem>>) attributes {dimension_semantics = [#tpu.dimension_semantics<parallel>], iteration_bounds = array<i64: 1>, scalar_prefetch = 0 : i64, scratch_operands = 0 : i64, tpu.core_type = #tpu.core_type<tc>, window_params = [{transform_indices = @transform_0, window_bounds = array<i64: 8, 16>}, {transform_indices = @transform_1, window_bounds = array<i64: 8, 4>}, {pipeline_mode = #tpu.pipeline_mode<synchronous>, transform_indices = @transform_2, window_bounds = array<i64: 16, 256>}, {pipeline_mode = #tpu.pipeline_mode<synchronous>, transform_indices = @transform_3, window_bounds = array<i64: 4, 256>}, {pipeline_mode = #tpu.pipeline_mode<synchronous>, transform_indices = @transform_4, window_bounds = array<i64: 1, 256>}, {pipeline_mode = #tpu.pipeline_mode<synchronous>, transform_indices = @transform_5, window_bounds = array<i64: 256, 256>}, {pipeline_mode = #tpu.pipeline_mode<synchronous>, transform_indices = @transform_6, window_bounds = array<i64: 1, 256>}, {pipeline_mode = #tpu.pipeline_mode<synchronous>, transform_indices = @transform_7, window_bounds = array<i64: 256, 2>}, {pipeline_mode = #tpu.pipeline_mode<synchronous>, transform_indices = @transform_8, window_bounds = array<i64: 1, 2>}, {transform_indices = @transform_9, window_bounds = array<i64: 8, 2>}]} {
    %c0 = arith.constant 0 : index
    %c0_0 = arith.constant 0 : index
    %0 = vector.load %arg1[%c0, %c0_0] : memref<8x16xf32, #tpu.memory_space<vmem>>, vector<8x16xf32>
    %c0_1 = arith.constant 0 : index
    %c0_2 = arith.constant 0 : index
    %1 = vector.load %arg3[%c0_1, %c0_2] : memref<16x256xf32, #tpu.memory_space<vmem>>, vector<16x256xf32>
    %cst = arith.constant dense<0.000000e+00> : vector<8x256xf32>
    %2 = tpu.matmul %0, %1, %cst {dimension_numbers = #tpu.dot_dimension_numbers<[1], [0], [0], [1], [0, 0, 1, 1], [], []>} : vector<8x16xf32>, vector<16x256xf32>, vector<8x256xf32> -> vector<8x256xf32>
    %c0_3 = arith.constant 0 : index
    %c0_4 = arith.constant 0 : index
    %3 = vector.load %arg2[%c0_3, %c0_4] : memref<8x4xf32, #tpu.memory_space<vmem>>, vector<8x4xf32>
    %c0_5 = arith.constant 0 : index
    %c0_6 = arith.constant 0 : index
    %4 = vector.load %arg4[%c0_5, %c0_6] : memref<4x256xf32, #tpu.memory_space<vmem>>, vector<4x256xf32>
    %cst_7 = arith.constant dense<0.000000e+00> : vector<8x256xf32>
    %5 = tpu.matmul %3, %4, %cst_7 {dimension_numbers = #tpu.dot_dimension_numbers<[1], [0], [0], [1], [0, 0, 1, 1], [], []>} : vector<8x4xf32>, vector<4x256xf32>, vector<8x256xf32> -> vector<8x256xf32>
    %6 = arith.addf %2, %5 : vector<8x256xf32>
    %c0_8 = arith.constant 0 : index
    %c0_9 = arith.constant 0 : index
    %7 = vector.load %arg5[%c0_8, %c0_9] : memref<1x256xf32, #tpu.memory_space<vmem>>, vector<1x256xf32>
    %8 = vector.broadcast %7 : vector<1x256xf32> to vector<8x256xf32>
    %9 = arith.addf %6, %8 : vector<8x256xf32>
    %cst_10 = arith.constant 0.000000e+00 : f32
    %10 = vector.broadcast %cst_10 : f32 to vector<8x256xf32>
    %11 = arith.maximumf %9, %10 : vector<8x256xf32>
    %c0_11 = arith.constant 0 : index
    %c0_12 = arith.constant 0 : index
    %12 = vector.load %arg6[%c0_11, %c0_12] : memref<256x256xf32, #tpu.memory_space<vmem>>, vector<256x256xf32>
    %cst_13 = arith.constant dense<0.000000e+00> : vector<8x256xf32>
    %13 = tpu.matmul %11, %12, %cst_13 {dimension_numbers = #tpu.dot_dimension_numbers<[1], [0], [0], [1], [0, 0, 1, 1], [], []>} : vector<8x256xf32>, vector<256x256xf32>, vector<8x256xf32> -> vector<8x256xf32>
    %c0_14 = arith.constant 0 : index
    %c0_15 = arith.constant 0 : index
    %14 = vector.load %arg7[%c0_14, %c0_15] : memref<1x256xf32, #tpu.memory_space<vmem>>, vector<1x256xf32>
    %15 = vector.broadcast %14 : vector<1x256xf32> to vector<8x256xf32>
    %16 = arith.addf %13, %15 : vector<8x256xf32>
    %cst_16 = arith.constant 0.000000e+00 : f32
    %17 = vector.broadcast %cst_16 : f32 to vector<8x256xf32>
    %18 = arith.maximumf %16, %17 : vector<8x256xf32>
    %c0_17 = arith.constant 0 : index
    %c0_18 = arith.constant 0 : index
    %19 = vector.load %arg8[%c0_17, %c0_18] : memref<256x2xf32, #tpu.memory_space<vmem>>, vector<256x2xf32>
    %cst_19 = arith.constant dense<0.000000e+00> : vector<8x2xf32>
    %20 = tpu.matmul %18, %19, %cst_19 {dimension_numbers = #tpu.dot_dimension_numbers<[1], [0], [0], [1], [0, 0, 1, 1], [], []>} : vector<8x256xf32>, vector<256x2xf32>, vector<8x2xf32> -> vector<8x2xf32>
    %c0_20 = arith.constant 0 : index
    %c0_21 = arith.constant 0 : index
    %21 = vector.load %arg9[%c0_20, %c0_21] : memref<1x2xf32, #tpu.memory_space<vmem>>, vector<1x2xf32>
    %22 = vector.broadcast %21 : vector<1x2xf32> to vector<8x2xf32>
    %23 = arith.addf %20, %22 : vector<8x2xf32>
    %c0_22 = arith.constant 0 : index
    %c0_23 = arith.constant 0 : index
    %24 = vector.load %arg10[%c0_22, %c0_23] : memref<8x2xf32, #tpu.memory_space<vmem>>, vector<8x2xf32>
    tpu.vector_store %arg10[%c0_22, %c0_23], %23 {strides = array<i32>} : memref<8x2xf32, #tpu.memory_space<vmem>>, vector<8x2xf32>,
    return
  }
  func.func @transform_0(%arg0: i32) -> (i32, i32) {
    %c0_i32 = arith.constant 0 : i32
    %c0_i32_0 = arith.constant 0 : i32
    return %arg0, %c0_i32 : i32, i32
  }
  func.func @transform_1(%arg0: i32) -> (i32, i32) {
    %c0_i32 = arith.constant 0 : i32
    %c0_i32_0 = arith.constant 0 : i32
    return %arg0, %c0_i32 : i32, i32
  }
  func.func @transform_2(%arg0: i32) -> (i32, i32) {
    %c0_i32 = arith.constant 0 : i32
    %c0_i32_0 = arith.constant 0 : i32
    %c0_i32_1 = arith.constant 0 : i32
    return %c0_i32, %c0_i32_0 : i32, i32
  }
  func.func @transform_3(%arg0: i32) -> (i32, i32) {
    %c0_i32 = arith.constant 0 : i32
    %c0_i32_0 = arith.constant 0 : i32
    %c0_i32_1 = arith.constant 0 : i32
    return %c0_i32, %c0_i32_0 : i32, i32
  }
  func.func @transform_4(%arg0: i32) -> (i32, i32) {
    %c0_i32 = arith.constant 0 : i32
    %c0_i32_0 = arith.constant 0 : i32
    %c0_i32_1 = arith.constant 0 : i32
    return %c0_i32, %c0_i32_0 : i32, i32
  }
  func.func @transform_5(%arg0: i32) -> (i32, i32) {
    %c0_i32 = arith.constant 0 : i32
    %c0_i32_0 = arith.constant 0 : i32
    %c0_i32_1 = arith.constant 0 : i32
    return %c0_i32, %c0_i32_0 : i32, i32
  }
  func.func @transform_6(%arg0: i32) -> (i32, i32) {
    %c0_i32 = arith.constant 0 : i32
    %c0_i32_0 = arith.constant 0 : i32
    %c0_i32_1 = arith.constant 0 : i32
    return %c0_i32, %c0_i32_0 : i32, i32
  }
  func.func @transform_7(%arg0: i32) -> (i32, i32) {
    %c0_i32 = arith.constant 0 : i32
    %c0_i32_0 = arith.constant 0 : i32
    %c0_i32_1 = arith.constant 0 : i32
    return %c0_i32, %c0_i32_0 : i32, i32
  }
  func.func @transform_8(%arg0: i32) -> (i32, i32) {
    %c0_i32 = arith.constant 0 : i32
    %c0_i32_0 = arith.constant 0 : i32
    %c0_i32_1 = arith.constant 0 : i32
    return %c0_i32, %c0_i32_0 : i32, i32
  }
  func.func @transform_9(%arg0: i32) -> (i32, i32) {
    %c0_i32 = arith.constant 0 : i32
    %c0_i32_0 = arith.constant 0 : i32
    return %arg0, %c0_i32 : i32, i32
  }
}

</mosaic_0001>

<bundles_post_ra>
// kernel: critic_forward.1
= control target key start
LH: loop header
LB: loop body
LE: loop exit
PB: predicated region body
PF: predicated region fallthrough
CT: control target
= control target key end

     0   :  { %14 = vsyncpa [#allocation3], 0  ;;  %s662_s30 = smov [#allocation2]   ;;  %s859_s0 = inlined_call_operand.vmem [shape: f32[8,16], index: 0, kind: input, shape index: {}]   ;;  %s860_s1 = inlined_call_operand.vmem [shape: f32[8,4], index: 1, kind: input, shape index: {}]   ;;  %s861_s2 = inlined_call_operand.vmem [shape: f32[16,256], index: 2, kind: input, shape index: {}]   ;;  %s862_s3 = inlined_call_operand.vmem [shape: f32[4,256], index: 3, kind: input, shape index: {}]   ;;  %s863_s4 = inlined_call_operand.vmem [shape: f32[1,256], index: 4, kind: input, shape index: {}]   ;;  %s864_s5 = inlined_call_operand.hbm [shape: f32[256,256], index: 5, kind: input, shape index: {}]   ;;  %s865_s6 = inlined_call_operand.vmem [shape: f32[1,256], index: 6, kind: input, shape index: {}]   ;;  %s866_s7 = inlined_call_operand.vmem [shape: f32[256,2], index: 7, kind: input, shape index: {}]   ;;  %s867_s8 = inlined_call_operand.vmem [shape: f32[1,2], index: 8, kind: input, shape index: {}]   ;;  %s868_s9 = inlined_call_operand.vmem [shape: f32[8,2], index: 9, kind: output, shape index: {}]  }
   0x1   :  { %s30_s10 = sshll.u32 %s662_s30, 4  ;;  %s638_s13 = scalar_lea.hbm %s864_s5, 8192  ;;  %s31_s10 = int_to_ptr.vmem [resolvable:$true] %s30_s10 }
   0x2   :  { %p639_p0 = scmp.ne.s32.totalorder %s864_s5, %s638_s13  ;;  %p642_p1 = scmp.lt.u32.totalorder %s638_s13, %s864_s5 }
   0x4   :  { %p644_p2 = pnand %p642_p1, %p639_p0 }
   0x6   :  { %647 = shalt.err (!%p644_p2)
}
   0x7   :  { %s648_s18 = scalar_lea.vmem %s31_s10, 8192  ;;  %p653_p4 = scmp.lt.s32.totalorder %s31_s10, %s31_s10 }
   0x8   :  { %p649_p3 = scmp.ne.s32.totalorder %s31_s10, %s648_s18  ;;  %p654_p5 = scmp.lt.s32.totalorder %s648_s18, %s648_s18 }
   0xa   :  { %p655_p6 = por %p654_p5, %p653_p4 }
   0xc   :  { %p656_p7 = pnand %p655_p6, %p649_p3 }
   0xe   :  { %659 = shalt.err (!%p656_p7)
}
   0xf   :  { %s663_s19 = smov 256   ;;  %s664_s20 = smov 16  }
  0x10   :  { %36 = dma.hbm_to_vmem [thread:$0]  %s864_s5, 8192, %s31_s10, [#allocation3], %s663_s19, %s663_s19, %s664_s20  }
  0x11   :  { %660 = dma.done.wait [#allocation3], 8192  }
  0x12   :  { %661 = vsyncadd [#allocation3], 4294959104  ;;  %v665_v0 = vmov 0.0   ;;  %v52_v1 = vld [vmem:[%s862_s3] sm:$0xff]  ;;  %vm59_vm0 = vcmask 1043456   ;;  %v48_v2 = vld [vmem:[%s861_s2 + $0x8] sm:$0xff] }
  0x13   :  { %128 = vmatprep.mubr.f32.mxu0 %v665_v0  ;;  %v54_v3 = vcombine.high %v52_v1, %v52_v1  ;;  %v50_v4 = vld [vmem:[%s861_s2 + $0x18] sm:$0xff]  ;;  %v47_v5 = vld [vmem:[%s861_s2] sm:$0xff]  ;;  %v49_v6 = vld [vmem:[%s861_s2 + $0x10] sm:$0xff]  ;;  %vm55_vm1 = vcmask 31744   ;;  %vm135_vm2 = vcmask 130048   ;;  %vm484_vm3 = vcmask 15360  }
  0x14   :  { %v51_v7 = vld [vmem:[%s860_s1] sm:$0xff]  ;;  %v531_v8 = vpack.c.bf16 %v50_v4, %v48_v2  ;;  %v533_v9 = vpack.c.bf16 %v49_v6, %v47_v5  ;;  %v227_v10 = vld [vmem:[#allocation2 + $0x8] sm:$0xff]  ;;  %v229_v11 = vld [vmem:[#allocation2 + $0x18] sm:$0xff] }
  0x15   :  { %491 = vmatprep.subr.msk.mxu0 %vm59_vm0, %v54_v3  ;;  %v535_v12 = vpack.c.bf16 %v229_v11, %v227_v10  ;;  %v226_v13 = vld [vmem:[#allocation2] sm:$0xff]  ;;  %v228_v14 = vld [vmem:[#allocation2 + $0x10] sm:$0xff]  ;;  %v231_v15 = vld [vmem:[#allocation2 + $0x28] sm:$0xff] }
  0x16   :  { %492 = vmatpush1.msk.msra.mxu0 %vm59_vm0, %v52_v1  ;;  %v537_v16 = vpack.c.bf16 %v228_v14, %v226_v13  ;;  %v233_v17 = vld [vmem:[#allocation2 + $0x38] sm:$0xff]  ;;  %v230_v19 = vld [vmem:[#allocation2 + $0x20] sm:$0xff]  ;;  %v232_v20 = vld [vmem:[#allocation2 + $0x30] sm:$0xff] }
  0x17   :  { %493 = vmatmul.mubr.msk.f32.vlgmr.msra.gmra.mrb[0].mxu0 %vm55_vm1, %v51_v7  ;;  %532 = vmatprep.subr.bf16.mxu0 %v531_v8  ;;  %v539_v18 = vpack.c.bf16 %v233_v17, %v231_v15  ;;  %v235_v21 = vld [vmem:[#allocation2 + $0x48] sm:$0xff]  ;;  %v237_v22 = vld [vmem:[#allocation2 + $0x58] sm:$0xff]  ;;  %v541_v23 = vpack.c.bf16 %v232_v20, %v230_v19  ;;  %v234_v25 = vld [vmem:[#allocation2 + $0x40] sm:$0xff] }
  0x18   :  { %534 = vmatpush1.bf16.msra.mxu0 %v533_v9  ;;  %203 = vmatprep.mubr.f32.mxu0 %v665_v0  ;;  %v543_v24 = vpack.c.bf16 %v237_v22, %v235_v21  ;;  %v236_v26 = vld [vmem:[#allocation2 + $0x50] sm:$0xff]  ;;  %v46_v27 = vld [vmem:[%s859_s0] sm:$0xff]  ;;  %v239_v28 = vld [vmem:[#allocation2 + $0x68] sm:$0xff] }
  0x19   :  { %536 = vmatprep.subr.bf16.mxu1 %v535_v12  ;;  %v241_v29 = vld [vmem:[#allocation2 + $0x78] sm:$0xff]  ;;  %v545_v30 = vpack.c.bf16 %v236_v26, %v234_v25  ;;  %v238_v32 = vld [vmem:[#allocation2 + $0x60] sm:$0xff]  ;;  %v240_v33 = vld [vmem:[#allocation2 + $0x70] sm:$0xff] }
  0x1a   :  { %538 = vmatpush1.bf16.msra.mxu1 %v537_v16  ;;  %v547_v31 = vpack.c.bf16 %v241_v29, %v239_v28  ;;  %v243_v34 = vld [vmem:[#allocation2 + $0x88] sm:$0xff]  ;;  %v245_v35 = vld [vmem:[#allocation2 + $0x98] sm:$0xff]  ;;  %v549_v36 = vpack.c.bf16 %v240_v33, %v238_v32  ;;  %v242_v38 = vld [vmem:[#allocation2 + $0x80] sm:$0xff] }
  0x1b   :  { %540 = vmatprep.subr.bf16.mxu1 %v539_v18  ;;  %v551_v37 = vpack.c.bf16 %v245_v35, %v243_v34  ;;  %v244_v39 = vld [vmem:[#allocation2 + $0x90] sm:$0xff]  ;;  %v247_v40 = vld [vmem:[#allocation2 + $0xa8] sm:$0xff]  ;;  %v249_v41 = vld [vmem:[#allocation2 + $0xb8] sm:$0xff] }
  0x1c   :  { %v553_v42 = vpack.c.bf16 %v244_v39, %v242_v38  ;;  %v555_v43 = vpack.c.bf16 %v249_v41, %v247_v40  ;;  %v246_v44 = vld [vmem:[#allocation2 + $0xa0] sm:$0xff]  ;;  %v248_v45 = vld [vmem:[#allocation2 + $0xb0] sm:$0xff]  ;;  %v251_v46 = vld [vmem:[#allocation2 + $0xc8] sm:$0xff] }
  0x1d   :  { %v253_v47 = vld [vmem:[#allocation2 + $0xd8] sm:$0xff]  ;;  %v557_v48 = vpack.c.bf16 %v248_v45, %v246_v44  ;;  %v250_v50 = vld [vmem:[#allocation2 + $0xc0] sm:$0xff]  ;;  %v252_v51 = vld [vmem:[#allocation2 + $0xd0] sm:$0xff] }
  0x1e   :  { %542 = vmatpush1.bf16.msra.mxu1 %v541_v23  ;;  %v559_v49 = vpack.c.bf16 %v253_v47, %v251_v46  ;;  %v255_v52 = vld [vmem:[#allocation2 + $0xe8] sm:$0xff]  ;;  %v257_v53 = vld [vmem:[#allocation2 + $0xf8] sm:$0xff]  ;;  %v561_v54 = vpack.c.bf16 %v252_v51, %v250_v50  ;;  %v254_v56 = vld [vmem:[#allocation2 + $0xe0] sm:$0xff] }
  0x1f   :  { %494 = vmatmul.mubr.msk.f32.vlgmr.msra.gmra.mrb[0].mxu0 %vm135_vm2, %v46_v27  ;;  %544 = vmatprep.subr.bf16.mxu1 %v543_v24  ;;  %v563_v55 = vpack.c.bf16 %v257_v53, %v255_v52  ;;  %v256_v57 = vld [vmem:[#allocation2 + $0xf0] sm:$0xff]  ;;  %v259_v58 = vld [vmem:[#allocation2 + $0x108] sm:$0xff]  ;;  %v261_v59 = vld [vmem:[#allocation2 + $0x118] sm:$0xff] }
  0x20   :  { %v565_v60 = vpack.c.bf16 %v256_v57, %v254_v56  ;;  %v567_v61 = vpack.c.bf16 %v261_v59, %v259_v58  ;;  %v258_v62 = vld [vmem:[#allocation2 + $0x100] sm:$0xff]  ;;  %v260_v63 = vld [vmem:[#allocation2 + $0x110] sm:$0xff]  ;;  %v263_v0 = vld [vmem:[#allocation2 + $0x128] sm:$0xff] }
  0x21   :  { %v265_v1 = vld [vmem:[#allocation2 + $0x138] sm:$0xff]  ;;  %v569_v2 = vpack.c.bf16 %v260_v63, %v258_v62  ;;  %v262_v4 = vld [vmem:[#allocation2 + $0x120] sm:$0xff]  ;;  %v264_v5 = vld [vmem:[#allocation2 + $0x130] sm:$0xff] }
  0x22   :  { %546 = vmatpush1.bf16.msra.mxu1 %v545_v30  ;;  %v571_v3 = vpack.c.bf16 %v265_v1, %v263_v0  ;;  %v267_v6 = vld [vmem:[#allocation2 + $0x148] sm:$0xff]  ;;  %v269_v7 = vld [vmem:[#allocation2 + $0x158] sm:$0xff]  ;;  %v573_v8 = vpack.c.bf16 %v264_v5, %v262_v4  ;;  %v266_v10 = vld [vmem:[#allocation2 + $0x140] sm:$0xff] }
  0x23   :  { %548 = vmatprep.subr.bf16.mxu1 %v547_v31  ;;  %v575_v9 = vpack.c.bf16 %v269_v7, %v267_v6  ;;  %v268_v11 = vld [vmem:[#allocation2 + $0x150] sm:$0xff]  ;;  %v271_v12 = vld [vmem:[#allocation2 + $0x168] sm:$0xff]  ;;  %v273_v13 = vld [vmem:[#allocation2 + $0x178] sm:$0xff] }
  0x24   :  { %v577_v14 = vpack.c.bf16 %v268_v11, %v266_v10  ;;  %v579_v15 = vpack.c.bf16 %v273_v13, %v271_v12  ;;  %v270_v16 = vld [vmem:[#allocation2 + $0x160] sm:$0xff]  ;;  %v272_v17 = vld [vmem:[#allocation2 + $0x170] sm:$0xff]  ;;  %v275_v18 = vld [vmem:[#allocation2 + $0x188] sm:$0xff] }
  0x25   :  { %v277_v19 = vld [vmem:[#allocation2 + $0x198] sm:$0xff]  ;;  %v581_v20 = vpack.c.bf16 %v272_v17, %v270_v16  ;;  %v274_v22 = vld [vmem:[#allocation2 + $0x180] sm:$0xff]  ;;  %v276_v23 = vld [vmem:[#allocation2 + $0x190] sm:$0xff] }
  0x26   :  { %550 = vmatpush1.bf16.msra.mxu1 %v549_v36  ;;  %v583_v21 = vpack.c.bf16 %v277_v19, %v275_v18  ;;  %v279_v24 = vld [vmem:[#allocation2 + $0x1a8] sm:$0xff]  ;;  %v281_v25 = vld [vmem:[#allocation2 + $0x1b8] sm:$0xff]  ;;  %v585_v26 = vpack.c.bf16 %v276_v23, %v274_v22  ;;  %v278_v28 = vld [vmem:[#allocation2 + $0x1a0] sm:$0xff]  ;;  %v212_v18 = vlaneseq }
  0x27   :  { %552 = vmatprep.subr.bf16.mxu1 %v551_v37  ;;  %v587_v27 = vpack.c.bf16 %v281_v25, %v279_v24  ;;  %v280_v29 = vld [vmem:[#allocation2 + $0x1b0] sm:$0xff]  ;;  %v283_v30 = vld [vmem:[#allocation2 + $0x1c8] sm:$0xff]  ;;  %v285_v31 = vld [vmem:[#allocation2 + $0x1d8] sm:$0xff] }
  0x28   :  { %v589_v32 = vpack.c.bf16 %v280_v29, %v278_v28  ;;  %v591_v33 = vpack.c.bf16 %v285_v31, %v283_v30  ;;  %v282_v34 = vld [vmem:[#allocation2 + $0x1c0] sm:$0xff]  ;;  %v284_v35 = vld [vmem:[#allocation2 + $0x1d0] sm:$0xff]  ;;  %v287_v37 = vld [vmem:[#allocation2 + $0x1e8] sm:$0xff]  ;;  %v213_v19 = vshrl.u32 %v212_v18, 7 }
  0x29   :  { %v593_v36 = vpack.c.bf16 %v284_v35, %v282_v34  ;;  %v289_v38 = vld [vmem:[#allocation2 + $0x1f8] sm:$0xff]  ;;  %v286_v40 = vld [vmem:[#allocation2 + $0x1e0] sm:$0xff]  ;;  %v288_v41 = vld [vmem:[#allocation2 + $0x1f0] sm:$0xff] }
  0x2a   :  { %554 = vmatpush1.bf16.msra.mxu1 %v553_v42  ;;  %v595_v39 = vpack.c.bf16 %v289_v38, %v287_v37  ;;  %v597_v42 = vpack.c.bf16 %v288_v41, %v286_v40  ;;  %v392_v44 = vld [vmem:[%s866_s7 + $0x88] sm:$0xff]  ;;  %v375_v45 = vld [vmem:[%s866_s7] sm:$0xff]  ;;  %v377_v52 = vld [vmem:[%s866_s7 + $0x10] sm:$0xff]  ;;  %v218_v22 = vsub.s32 1, %v213_v19 }
  0x2b   :  { %556 = vmatprep.subr.bf16.mxu1 %v555_v43  ;;  %v391_v43 = vld [vmem:[%s866_s7 + $0x80] sm:$0xff]  ;;  %v376_v47 = vld [vmem:[%s866_s7 + $0x8] sm:$0xff]  ;;  %v378_v53 = vld [vmem:[%s866_s7 + $0x18] sm:$0xff] }
  0x2c   :  { %v599_v46 = vpack.c.bf16 %v392_v44, %v391_v43  ;;  %v601_v50 = vpack.c.bf16 %v376_v47, %v375_v45  ;;  %v605_v56 = vpack.c.bf16 %v378_v53, %v377_v52  ;;  %v379_v58 = vld [vmem:[%s866_s7 + $0x20] sm:$0xff]  ;;  %v380_v59 = vld [vmem:[%s866_s7 + $0x28] sm:$0xff]  ;;  %v381_v0 = vld [vmem:[%s866_s7 + $0x30] sm:$0xff] }
  0x2d   :  { %v609_v62 = vpack.c.bf16 %v380_v59, %v379_v58  ;;  %v382_v1 = vld [vmem:[%s866_s7 + $0x38] sm:$0xff]  ;;  %v383_v6 = vld [vmem:[%s866_s7 + $0x40] sm:$0xff]  ;;  %v384_v7 = vld [vmem:[%s866_s7 + $0x48] sm:$0xff] }
  0x2e   :  { %558 = vmatpush1.bf16.msra.mxu1 %v557_v48  ;;  %v393_v48 = vld [vmem:[%s866_s7 + $0x90] sm:$0xff]  ;;  %600 = vmatprep.subr.bf16.mxu0 %v599_v46  ;;  %v613_v4 = vpack.c.bf16 %v382_v1, %v381_v0  ;;  %v617_v10 = vpack.c.bf16 %v384_v7, %v383_v6  ;;  %v386_v13 = vld [vmem:[%s866_s7 + $0x58] sm:$0xff]  ;;  %v387_v31 = vld [vmem:[%s866_s7 + $0x60] sm:$0xff] }
  0x2f   :  { %560 = vmatprep.subr.bf16.mxu1 %v559_v49  ;;  %v394_v49 = vld [vmem:[%s866_s7 + $0x98] sm:$0xff]  ;;  %602 = vmatpush3.bf16.msra.mxu0 %v601_v50  ;;  %v385_v12 = vld [vmem:[%s866_s7 + $0x50] sm:$0xff]  ;;  %v290_v40 = vld [vmem:[%s865_s6] sm:$0x3] }
  0x30   :  { %v603_v51 = vpack.c.bf16 %v394_v49, %v393_v48  ;;  %v621_v16 = vpack.c.bf16 %v386_v13, %v385_v12  ;;  %v405_v34 = vld [vmem:[%s866_s7 + $0xf0] sm:$0xff]  ;;  %v406_v35 = vld [vmem:[%s866_s7 + $0xf8] sm:$0xff]  ;;  %v495_v50 = vld [vmem:[%s867_s8] ss:$0 sm:$0xff] }
  0x31   :  { %v389_v37 = vld [vmem:[%s866_s7 + $0x70] sm:$0xff]  ;;  %v390_v38 = vld [vmem:[%s866_s7 + $0x78] sm:$0xff] }
  0x32   :  { %562 = vmatpush1.bf16.msra.mxu1 %v561_v54  ;;  %v395_v54 = vld [vmem:[%s866_s7 + $0xa0] sm:$0xff]  ;;  %604 = vmatprep.subr.bf16.mxu0 %v603_v51 }
  0x33   :  { %564 = vmatprep.subr.bf16.mxu1 %v563_v55  ;;  %v396_v55 = vld [vmem:[%s866_s7 + $0xa8] sm:$0xff]  ;;  %606 = vmatpush3.bf16.msra.mxu0 %v605_v56 }
  0x34   :  { %v607_v57 = vpack.c.bf16 %v396_v55, %v395_v54 }
  0x36   :  { %566 = vmatpush1.bf16.msra.mxu1 %v565_v60  ;;  %v397_v60 = vld [vmem:[%s866_s7 + $0xb0] sm:$0xff]  ;;  %608 = vmatprep.subr.bf16.mxu0 %v607_v57 }
  0x37   :  { %568 = vmatprep.subr.bf16.mxu1 %v567_v61  ;;  %v398_v61 = vld [vmem:[%s866_s7 + $0xb8] sm:$0xff]  ;;  %610 = vmatpush3.bf16.msra.mxu0 %v609_v62 }
  0x38   :  { %v611_v63 = vpack.c.bf16 %v398_v61, %v397_v60 }
  0x3a   :  { %570 = vmatpush1.bf16.msra.mxu1 %v569_v2  ;;  %v399_v2 = vld [vmem:[%s866_s7 + $0xc0] sm:$0xff]  ;;  %612 = vmatprep.subr.bf16.mxu0 %v611_v63 }
  0x3b   :  { %572 = vmatprep.subr.bf16.mxu1 %v571_v3  ;;  %v400_v3 = vld [vmem:[%s866_s7 + $0xc8] sm:$0xff]  ;;  %614 = vmatpush3.bf16.msra.mxu0 %v613_v4 }
  0x3c   :  { %v615_v5 = vpack.c.bf16 %v400_v3, %v399_v2 }
  0x3e   :  { %574 = vmatpush1.bf16.msra.mxu1 %v573_v8  ;;  %v401_v8 = vld [vmem:[%s866_s7 + $0xd0] sm:$0xff]  ;;  %616 = vmatprep.subr.bf16.mxu0 %v615_v5 }
  0x3f   :  { %576 = vmatprep.subr.bf16.mxu1 %v575_v9  ;;  %v402_v9 = vld [vmem:[%s866_s7 + $0xd8] sm:$0xff]  ;;  %618 = vmatpush3.bf16.msra.mxu0 %v617_v10 }
  0x40   :  { %v619_v11 = vpack.c.bf16 %v402_v9, %v401_v8 }
  0x42   :  { %578 = vmatpush1.bf16.msra.mxu1 %v577_v14  ;;  %v403_v14 = vld [vmem:[%s866_s7 + $0xe0] sm:$0xff]  ;;  %620 = vmatprep.subr.bf16.mxu0 %v619_v11 }
  0x43   :  { %580 = vmatprep.subr.bf16.mxu1 %v579_v15  ;;  %v404_v15 = vld [vmem:[%s866_s7 + $0xe8] sm:$0xff]  ;;  %622 = vmatpush3.bf16.msra.mxu0 %v621_v16 }
  0x44   :  { %v623_v17 = vpack.c.bf16 %v404_v15, %v403_v14 }
  0x46   :  { %582 = vmatpush1.bf16.msra.mxu1 %v581_v20  ;;  %624 = vmatprep.subr.bf16.mxu0 %v623_v17  ;;  %v214_v20 = vsub.s32 0, %v213_v19 }
  0x47   :  { %584 = vmatprep.subr.bf16.mxu1 %v583_v21  ;;  %v210_v21 = vld [vmem:[%s863_s4] sm:$0x3] }
  0x48   :  { %v215_v23 = vrot.slane %v210_v21, %v214_v20  ;;  %v219_v24 = vrot.slane %v210_v21, %v218_v22  ;;  %v295_v41 = vrot.slane %v290_v40, %v214_v20 }
  0x4a   :  { %586 = vmatpush1.bf16.msra.mxu1 %v585_v26 }
  0x4b   :  { %588 = vmatprep.subr.bf16.mxu1 %v587_v27 }
  0x4e   :  { %590 = vmatpush1.bf16.msra.mxu1 %v589_v32  ;;  %v388_v32 = vld [vmem:[%s866_s7 + $0x68] sm:$0xff] }
  0x4f   :  { %592 = vmatprep.subr.bf16.mxu1 %v591_v33  ;;  %v625_v33 = vpack.c.bf16 %v388_v32, %v387_v31 }
  0x51   :  { %626 = vmatpush3.bf16.msra.mxu0 %v625_v33 }
  0x52   :  { %594 = vmatpush1.bf16.msra.mxu1 %v593_v36  ;;  %v627_v36 = vpack.c.bf16 %v406_v35, %v405_v34 }
  0x53   :  { %596 = vmatprep.subr.bf16.mxu1 %v595_v39  ;;  %v629_v39 = vpack.c.bf16 %v390_v38, %v389_v37 }
  0x54   :  { %628 = vmatprep.subr.bf16.mxu0 %v627_v36 }
  0x55   :  { %630 = vmatpush3.bf16.msra.mxu0 %v629_v39 }
  0x56   :  { %598 = vmatpush1.bf16.msra.mxu1 %v597_v42  ;;  %v299_v42 = vrot.slane %v290_v40, %v218_v22 }
  0xf2   :  { %v205_v25 = vpop.f32.mrb[0].mxu0 }
  0xf3   :  { %v222_v26 = vadd.f32 %v215_v23, %v205_v25  ;;  %v207_v27 = vpop.f32.mrb[1].mxu0 }
  0xf4   :  { %v223_v28 = vadd.f32 %v219_v24, %v207_v27 }
  0xf5   :  { %v224_v30 = vmax.f32 %v222_v26, 0.0 }
  0xf6   :  { %v225_v29 = vmax.f32 %v223_v28, 0.0 }
  0xf8   :  { %366 = vmatprep.mubr.f32.mxu1 %v225_v29 }
  0xf9   :  { %367 = vmatmul.mubr.f32.vlgmr.msra.gmra.mrb[0].mxu1 %v224_v30 }
 0x1cc   :  { %v368_v43 = vpop.f32.mrb[0].mxu1 }
 0x1cd   :  { %v369_v44 = vadd.f32 %v368_v43, %v295_v41  ;;  %v370_v45 = vpop.f32.mrb[1].mxu1 }
 0x1ce   :  { %v371_v46 = vadd.f32 %v370_v45, %v299_v42 }
 0x1cf   :  { %v373_v48 = vmax.f32 %v369_v44, 0.0 }
 0x1d0   :  { %v374_v47 = vmax.f32 %v371_v46, 0.0 }
 0x1d2   :  { %478 = vmatprep.mubr.f32.mxu0 %v374_v47 }
 0x1d3   :  { %479 = vmatmul.mubr.f32.vlgmr.msra.gmra.mrb[2].mxu0 %v373_v48 }
 0x2a6   :  { %v528_v49 = vpop.f32.mrb[2].mxu0 }
 0x2a7   :  { %v529_v51 = vpop.f32.mrb[3].mxu0 }
 0x2a8   :  { %v530_v52 = vadd.f32 %v529_v51, %v528_v49 }
 0x2aa   :  { %v481_v53 = vadd.f32 %v530_v52, %v495_v50 }
 0x2ac   :  { %485 = vst.msk [vmem:[%s868_s9] sm:$0xff] %vm484_vm3, %v481_v53 }
 0x2ad   :  { %490 = vsyncpa [#allocation3], 1 }

</bundles_post_ra>
